<compile_context>
chip_gen: v7x
topology: tpu7x:2x2x1
jax: 0.10.0
libtpu: 0.0.40
codegen_flags: <defaults>
</compile_context>

<pallas_src>
import functools

import jax
import jax.numpy as jnp
from jax.experimental import pallas as pl
from jax.experimental.pallas import tpu as pltpu

ALPHA = 0.3
CE_RATIO = 0.3

LANES = 128
SUBLANES = 8
MAX_BLOCK_ROWS = 1024   # (1024,128) f32 = 512 KiB per pipeline buffer
NCORES = 2              # megacore split on v7x; plain sequential axis elsewhere


def _cdiv(a, b):
    return -(-a // b)


def _combo_kernel(p_ref, t_ref, o_ref, *, n_valid, block_rows, steps_per_core,
                  eps_lo, eps_hi):
    c = pl.program_id(0)   # core split ("parallel")
    j = pl.program_id(1)   # reduction steps ("arbitrary")

    @pl.when(j == 0)
    def _():
        o_ref[...] = jnp.zeros_like(o_ref)

    # Logical (unclamped) block index -> global element offset of this tile.
    # int32 math: fine for < 2**31 elements.
    blk_elems = block_rows * LANES
    logical_blk = c * steps_per_core + j
    blk_start = logical_blk * blk_elems

    p = p_ref[...].astype(jnp.float32)
    t = t_ref[...].astype(jnp.float32)

    def _accumulate(masked):
        pc = jnp.clip(p, eps_lo, eps_hi)
        # TODO(synk): if gt is guaranteed binary, selecting a single log via
        # jnp.where would halve EUP work; not assumed here.
        ce = t * jnp.log(pc) + (1.0 - ALPHA) * (1.0 - t) * jnp.log(1.0 - pc)
        quantities = (p * t, p, t, ce)
        if masked:
            rows_i = jax.lax.broadcasted_iota(jnp.int32, p.shape, 0)
            cols_i = jax.lax.broadcasted_iota(jnp.int32, p.shape, 1)
            gidx = blk_start + rows_i * LANES + cols_i
            valid = gidx < n_valid
            # jnp.where is a select, so NaN/Inf from garbage OOB lanes cannot
            # leak into the sums.
            quantities = tuple(jnp.where(valid, q, 0.0) for q in quantities)
        for k, q in enumerate(quantities):
            # (block_rows,128) -> (block_rows//8, 8, 128) splits exactly at
            # (8,128) tile boundaries, so the axis-0 sum is pure VPU vreg adds.
            o_ref[0, k] += jnp.sum(q.reshape(-1, SUBLANES, LANES), axis=0)

    # Blocks that extend past the valid element count (tail pad, partial edge
    # block, or a clamped duplicate block on the last core) take the masked
    # path; everything else takes the unmasked fast path.
    needs_mask = blk_start + blk_elems > n_valid

    @pl.when(jnp.logical_not(needs_mask))
    def _():
        _accumulate(masked=False)

    @pl.when(needs_mask)
    def _():
        _accumulate(masked=True)


def combo_loss(pred, gt, smooth=1.0, eps=1e-9):
    p = jnp.ravel(pred)          # keep native dtype in HBM
    t = jnp.ravel(gt)
    n = p.shape[0]

    rows = _cdiv(n, LANES)
    n_lanes = rows * LANES
    if n_lanes != n:
        # Tiny tail pad so the flat stream reshapes to (rows, 128); skipped
        # entirely (free contiguous reshape) when numel is lane aligned.
        p = jnp.pad(p, (0, n_lanes - n))
        t = jnp.pad(t, (0, n_lanes - n))
    p2 = p.reshape(rows, LANES)
    t2 = t.reshape(rows, LANES)

    block_rows = min(
        MAX_BLOCK_ROWS,
        max(SUBLANES, _cdiv(_cdiv(rows, NCORES), SUBLANES) * SUBLANES))
    total_blocks = _cdiv(rows, block_rows)
    steps_per_core = _cdiv(total_blocks, NCORES)

    eps_lo = float(eps)
    eps_hi = float(min(1.0 - eps, 1.0 - 2.0 ** -23))  # strictly < 1.0 in f32

    def in_map(c, j):
        # Clamp so a core whose last step over-hangs total_blocks re-reads the
        # last real block instead of DMA-ing out of bounds; its contribution
        # is fully masked inside the kernel.
        return (jnp.minimum(c * steps_per_core + j, total_blocks - 1), 0)

    kernel = functools.partial(
        _combo_kernel, n_valid=n, block_rows=block_rows,
        steps_per_core=steps_per_core, eps_lo=eps_lo, eps_hi=eps_hi)

    partials = pl.pallas_call(
        kernel,
        out_shape=jax.ShapeDtypeStruct((NCORES, 4, SUBLANES, LANES), jnp.float32),
        grid_spec=pltpu.PrefetchScalarGridSpec(
            num_scalar_prefetch=0,
            grid=(NCORES, steps_per_core),
            in_specs=[
                pl.BlockSpec((block_rows, LANES), in_map),
                pl.BlockSpec((block_rows, LANES), in_map),
            ],
            out_specs=pl.BlockSpec((1, 4, SUBLANES, LANES),
                                   lambda c, j: (c, 0, 0, 0)),
        ),
        compiler_params=pltpu.CompilerParams(
            dimension_semantics=("parallel", "arbitrary")),
    )(p2, t2)

    # Single cheap cross-lane reduce + finalize on (2,4,8,128) partials.
    sums = jnp.sum(partials, axis=(0, 2, 3))           # (4,) f32
    inter, p_sum, t_sum, ce_sum = sums[0], sums[1], sums[2], sums[3]
    dice = (2.0 * inter + smooth) / (p_sum + t_sum + smooth)
    weighted_ce = (-ALPHA) * ce_sum / jnp.float32(n)
    return CE_RATIO * weighted_ce - (1.0 - CE_RATIO) * dice


def combo_loss_ref(pred, gt, smooth=1.0, eps=1e-9):
    """Direct JAX translation of the PyTorch ComboLoss forward."""
    p = jnp.ravel(pred).astype(jnp.float32)
    t = jnp.ravel(gt).astype(jnp.float32)
    inter = jnp.sum(p * t)
    dice = (2.0 * inter + smooth) / (jnp.sum(p) + jnp.sum(t) + smooth)
    pc = jnp.clip(p, eps, 1.0 - eps)
    ce = -(ALPHA * (t * jnp.log(pc) + (1.0 - ALPHA) * (1.0 - t) * jnp.log(1.0 - pc)))
    return CE_RATIO * jnp.mean(ce) - (1.0 - CE_RATIO) * dice


if __name__ == "__main__":
    key = jax.random.PRNGKey(0)
    k1, k2, k3, k4 = jax.random.split(key, 4)

    # NCHW inputs, as the PyTorch module would receive from a segmentation head.
    pred = jax.nn.sigmoid(jax.random.normal(k1, (2, 4, 16, 16), dtype=jnp.float32))
    gt = jax.random.bernoulli(k2, p=0.4, shape=(2, 4, 16, 16)).astype(jnp.float32)
    loss = jax.block_until_ready(combo_loss(pred, gt))
    ref = jax.block_until_ready(combo_loss_ref(pred, gt))
    assert jnp.allclose(loss, ref, rtol=1e-5, atol=1e-6), (loss, ref)

    # Unaligned numel exercises the tail-mask path; bf16 exercises the
    # native-dtype (half-HBM-traffic) path.
    pred2 = jax.nn.sigmoid(
        jax.random.normal(k3, (2, 3, 15, 17), dtype=jnp.float32)).astype(jnp.bfloat16)
    gt2 = jax.random.bernoulli(k4, p=0.4, shape=(2, 3, 15, 17)).astype(jnp.bfloat16)
    loss2 = jax.block_until_ready(combo_loss(pred2, gt2))
    ref2 = jax.block_until_ready(combo_loss_ref(pred2, gt2))
    assert jnp.allclose(loss2, ref2, rtol=1e-4, atol=1e-5), (loss2, ref2)

    print("KERNEL_OK")
</pallas_src>

<mosaic_0001>
module attributes {stable_mosaic.version = 11 : i64} {
  func.func @_combo_kernel(%arg0: i32, %arg1: i32, %arg2: memref<8x128xf32, #tpu.memory_space<vmem>>, %arg3: memref<8x128xf32, #tpu.memory_space<vmem>>, %arg4: memref<1x4x8x128xf32, #tpu.memory_space<vmem>>) attributes {dimension_semantics = [#tpu.dimension_semantics<parallel>, #tpu.dimension_semantics<arbitrary>], iteration_bounds = array<i64: 2, 1>, scalar_prefetch = 0 : i64, scratch_operands = 0 : i64, tpu.core_type = #tpu.core_type<tc>, window_params = [{transform_indices = @transform_0, window_bounds = array<i64: 8, 128>}, {transform_indices = @transform_1, window_bounds = array<i64: 8, 128>}, {transform_indices = @transform_2, window_bounds = array<i64: 1, 4, 8, 128>}]} {
    %c0_i32 = arith.constant 0 : i32
    %0 = arith.cmpi eq, %arg1, %c0_i32 : i32
    %1 = arith.extui %0 : i1 to i32
    %c0_i32_0 = arith.constant 0 : i32
    %2 = arith.cmpi ne, %1, %c0_i32_0 : i32
    scf.if %2 {
      %cst = arith.constant 0.000000e+00 : f32
      %15 = vector.broadcast %cst : f32 to vector<1x4x8x128xf32>
      %c0_7 = arith.constant 0 : index
      %c0_8 = arith.constant 0 : index
      %c0_9 = arith.constant 0 : index
      %c0_10 = arith.constant 0 : index
      %16 = vector.load %arg4[%c0_7, %c0_8, %c0_9, %c0_10] : memref<1x4x8x128xf32, #tpu.memory_space<vmem>>, vector<1x4x8x128xf32>
      tpu.vector_store %arg4[%c0_7, %c0_8, %c0_9, %c0_10], %15 {strides = array<i32>} : memref<1x4x8x128xf32, #tpu.memory_space<vmem>>, vector<1x4x8x128xf32>,
    } else {
    }
    %c1_i32 = arith.constant 1 : i32
    %3 = arith.muli %arg0, %c1_i32 : i32
    %4 = arith.addi %3, %arg1 : i32
    %c1024_i32 = arith.constant 1024 : i32
    %5 = arith.muli %4, %c1024_i32 : i32
    %c0 = arith.constant 0 : index
    %c0_1 = arith.constant 0 : index
    %6 = vector.load %arg2[%c0, %c0_1] : memref<8x128xf32, #tpu.memory_space<vmem>>, vector<8x128xf32>
    %c0_2 = arith.constant 0 : index
    %c0_3 = arith.constant 0 : index
    %7 = vector.load %arg3[%c0_2, %c0_3] : memref<8x128xf32, #tpu.memory_space<vmem>>, vector<8x128xf32>
    %c1024_i32_4 = arith.constant 1024 : i32
    %8 = arith.addi %5, %c1024_i32_4 : i32
    %c2048_i32 = arith.constant 2048 : i32
    %9 = arith.cmpi sgt, %8, %c2048_i32 : i32
    %true = arith.constant true
    %10 = arith.xori %9, %true : i1
    %11 = arith.extui %10 : i1 to i32
    %c0_i32_5 = arith.constant 0 : i32
    %12 = arith.cmpi ne, %11, %c0_i32_5 : i32
    scf.if %12 {
      %cst = arith.constant 9.99999971E-10 : f32
      %cst_7 = arith.constant 0.99999988 : f32
      %15 = vector.broadcast %cst : f32 to vector<8x128xf32>
      %16 = arith.maximumf %15, %6 : vector<8x128xf32>
      %17 = vector.broadcast %cst_7 : f32 to vector<8x128xf32>
      %18 = arith.minimumf %17, %16 : vector<8x128xf32>
      %19 = math.log %18 : vector<8x128xf32>
      %20 = arith.mulf %7, %19 : vector<8x128xf32>
      %cst_8 = arith.constant 1.000000e+00 : f32
      %21 = vector.broadcast %cst_8 : f32 to vector<8x128xf32>
      %22 = arith.subf %21, %7 : vector<8x128xf32>
      %cst_9 = arith.constant 0.699999988 : f32
      %23 = vector.broadcast %cst_9 : f32 to vector<8x128xf32>
      %24 = arith.mulf %23, %22 : vector<8x128xf32>
      %cst_10 = arith.constant 1.000000e+00 : f32
      %25 = vector.broadcast %cst_10 : f32 to vector<8x128xf32>
      %26 = arith.subf %25, %18 : vector<8x128xf32>
      %27 = math.log %26 : vector<8x128xf32>
      %28 = arith.mulf %24, %27 : vector<8x128xf32>
      %29 = arith.addf %20, %28 : vector<8x128xf32>
      %30 = arith.mulf %6, %7 : vector<8x128xf32>
      %c0_11 = arith.constant 0 : index
      %c0_12 = arith.constant 0 : index
      %c0_13 = arith.constant 0 : index
      %c0_14 = arith.constant 0 : index
      %31 = vector.load %arg4[%c0_11, %c0_12, %c0_13, %c0_14] : memref<1x4x8x128xf32, #tpu.memory_space<vmem>>, vector<1x1x8x128xf32>
      %32 = vector.shape_cast %31 : vector<1x1x8x128xf32> to vector<8x128xf32>
      %33 = vector.shape_cast %30 : vector<8x128xf32> to vector<1x8x128xf32>
      %cst_15 = arith.constant dense<0.000000e+00> : vector<8x128xf32>
      %34 = vector.multi_reduction <add>, %33, %cst_15 [0] : vector<1x8x128xf32> to vector<8x128xf32>
      %35 = arith.addf %32, %34 : vector<8x128xf32>
      %c0_16 = arith.constant 0 : index
      %c0_17 = arith.constant 0 : index
      %c0_18 = arith.constant 0 : index
      %c0_19 = arith.constant 0 : index
      %36 = vector.load %arg4[%c0_16, %c0_17, %c0_18, %c0_19] : memref<1x4x8x128xf32, #tpu.memory_space<vmem>>, vector<1x1x8x128xf32>
      %37 = vector.shape_cast %36 : vector<1x1x8x128xf32> to vector<8x128xf32>
      %38 = vector.shape_cast %35 : vector<8x128xf32> to vector<1x1x8x128xf32>
      tpu.vector_store %arg4[%c0_16, %c0_17, %c0_18, %c0_19], %38 {strides = array<i32>} : memref<1x4x8x128xf32, #tpu.memory_space<vmem>>, vector<1x1x8x128xf32>,
      %c0_20 = arith.constant 0 : index
      %c1 = arith.constant 1 : index
      %c0_21 = arith.constant 0 : index
      %c0_22 = arith.constant 0 : index
      %39 = vector.load %arg4[%c0_20, %c1, %c0_21, %c0_22] : memref<1x4x8x128xf32, #tpu.memory_space<vmem>>, vector<1x1x8x128xf32>
      %40 = vector.shape_cast %39 : vector<1x1x8x128xf32> to vector<8x128xf32>
      %41 = vector.shape_cast %6 : vector<8x128xf32> to vector<1x8x128xf32>
      %cst_23 = arith.constant dense<0.000000e+00> : vector<8x128xf32>
      %42 = vector.multi_reduction <add>, %41, %cst_23 [0] : vector<1x8x128xf32> to vector<8x128xf32>
      %43 = arith.addf %40, %42 : vector<8x128xf32>
      %c0_24 = arith.constant 0 : index
      %c1_25 = arith.constant 1 : index
      %c0_26 = arith.constant 0 : index
      %c0_27 = arith.constant 0 : index
      %44 = vector.load %arg4[%c0_24, %c1_25, %c0_26, %c0_27] : memref<1x4x8x128xf32, #tpu.memory_space<vmem>>, vector<1x1x8x128xf32>
      %45 = vector.shape_cast %44 : vector<1x1x8x128xf32> to vector<8x128xf32>
      %46 = vector.shape_cast %43 : vector<8x128xf32> to vector<1x1x8x128xf32>
      tpu.vector_store %arg4[%c0_24, %c1_25, %c0_26, %c0_27], %46 {strides = array<i32>} : memref<1x4x8x128xf32, #tpu.memory_space<vmem>>, vector<1x1x8x128xf32>,
      %c0_28 = arith.constant 0 : index
      %c2 = arith.constant 2 : index
      %c0_29 = arith.constant 0 : index
      %c0_30 = arith.constant 0 : index
      %47 = vector.load %arg4[%c0_28, %c2, %c0_29, %c0_30] : memref<1x4x8x128xf32, #tpu.memory_space<vmem>>, vector<1x1x8x128xf32>
      %48 = vector.shape_cast %47 : vector<1x1x8x128xf32> to vector<8x128xf32>
      %49 = vector.shape_cast %7 : vector<8x128xf32> to vector<1x8x128xf32>
      %cst_31 = arith.constant dense<0.000000e+00> : vector<8x128xf32>
      %50 = vector.multi_reduction <add>, %49, %cst_31 [0] : vector<1x8x128xf32> to vector<8x128xf32>
      %51 = arith.addf %48, %50 : vector<8x128xf32>
      %c0_32 = arith.constant 0 : index
      %c2_33 = arith.constant 2 : index
      %c0_34 = arith.constant 0 : index
      %c0_35 = arith.constant 0 : index
      %52 = vector.load %arg4[%c0_32, %c2_33, %c0_34, %c0_35] : memref<1x4x8x128xf32, #tpu.memory_space<vmem>>, vector<1x1x8x128xf32>
      %53 = vector.shape_cast %52 : vector<1x1x8x128xf32> to vector<8x128xf32>
      %54 = vector.shape_cast %51 : vector<8x128xf32> to vector<1x1x8x128xf32>
      tpu.vector_store %arg4[%c0_32, %c2_33, %c0_34, %c0_35], %54 {strides = array<i32>} : memref<1x4x8x128xf32, #tpu.memory_space<vmem>>, vector<1x1x8x128xf32>,
      %c0_36 = arith.constant 0 : index
      %c3 = arith.constant 3 : index
      %c0_37 = arith.constant 0 : index
      %c0_38 = arith.constant 0 : index
      %55 = vector.load %arg4[%c0_36, %c3, %c0_37, %c0_38] : memref<1x4x8x128xf32, #tpu.memory_space<vmem>>, vector<1x1x8x128xf32>
      %56 = vector.shape_cast %55 : vector<1x1x8x128xf32> to vector<8x128xf32>
      %57 = vector.shape_cast %29 : vector<8x128xf32> to vector<1x8x128xf32>
      %cst_39 = arith.constant dense<0.000000e+00> : vector<8x128xf32>
      %58 = vector.multi_reduction <add>, %57, %cst_39 [0] : vector<1x8x128xf32> to vector<8x128xf32>
      %59 = arith.addf %56, %58 : vector<8x128xf32>
      %c0_40 = arith.constant 0 : index
      %c3_41 = arith.constant 3 : index
      %c0_42 = arith.constant 0 : index
      %c0_43 = arith.constant 0 : index
      %60 = vector.load %arg4[%c0_40, %c3_41, %c0_42, %c0_43] : memref<1x4x8x128xf32, #tpu.memory_space<vmem>>, vector<1x1x8x128xf32>
      %61 = vector.shape_cast %60 : vector<1x1x8x128xf32> to vector<8x128xf32>
      %62 = vector.shape_cast %59 : vector<8x128xf32> to vector<1x1x8x128xf32>
      tpu.vector_store %arg4[%c0_40, %c3_41, %c0_42, %c0_43], %62 {strides = array<i32>} : memref<1x4x8x128xf32, #tpu.memory_space<vmem>>, vector<1x1x8x128xf32>,
    } else {
    }
    %13 = arith.extui %9 : i1 to i32
    %c0_i32_6 = arith.constant 0 : i32
    %14 = arith.cmpi ne, %13, %c0_i32_6 : i32
    scf.if %14 {
      %cst = arith.constant 9.99999971E-10 : f32
      %cst_7 = arith.constant 0.99999988 : f32
      %15 = vector.broadcast %cst : f32 to vector<8x128xf32>
      %16 = arith.maximumf %15, %6 : vector<8x128xf32>
      %17 = vector.broadcast %cst_7 : f32 to vector<8x128xf32>
      %18 = arith.minimumf %17, %16 : vector<8x128xf32>
      %19 = math.log %18 : vector<8x128xf32>
      %20 = arith.mulf %7, %19 : vector<8x128xf32>
      %cst_8 = arith.constant 1.000000e+00 : f32
      %21 = vector.broadcast %cst_8 : f32 to vector<8x128xf32>
      %22 = arith.subf %21, %7 : vector<8x128xf32>
      %cst_9 = arith.constant 0.699999988 : f32
      %23 = vector.broadcast %cst_9 : f32 to vector<8x128xf32>
      %24 = arith.mulf %23, %22 : vector<8x128xf32>
      %cst_10 = arith.constant 1.000000e+00 : f32
      %25 = vector.broadcast %cst_10 : f32 to vector<8x128xf32>
      %26 = arith.subf %25, %18 : vector<8x128xf32>
      %27 = math.log %26 : vector<8x128xf32>
      %28 = arith.mulf %24, %27 : vector<8x128xf32>
      %29 = arith.addf %20, %28 : vector<8x128xf32>
      %30 = arith.mulf %6, %7 : vector<8x128xf32>
      %31 = tpu.iota {dimensions = array<i32: 0>} : vector<8x128xi32>
      %32 = tpu.iota {dimensions = array<i32: 1>} : vector<8x128xi32>
      %c128_i32 = arith.constant 128 : i32
      %33 = vector.broadcast %c128_i32 : i32 to vector<8x128xi32>
      %34 = arith.muli %31, %33 : vector<8x128xi32>
      %35 = vector.broadcast %5 : i32 to vector<8x128xi32>
      %36 = arith.addi %35, %34 : vector<8x128xi32>
      %37 = arith.addi %36, %32 : vector<8x128xi32>
      %c2048_i32_11 = arith.constant 2048 : i32
      %38 = vector.broadcast %c2048_i32_11 : i32 to vector<8x128xi32>
      %39 = arith.cmpi slt, %37, %38 : vector<8x128xi32>
      %cst_12 = arith.constant 0.000000e+00 : f32
      %40 = vector.broadcast %cst_12 : f32 to vector<8x128xf32>
      %41 = arith.select %39, %30, %40 : vector<8x128xi1>, vector<8x128xf32>
      %cst_13 = arith.constant 0.000000e+00 : f32
      %42 = vector.broadcast %cst_13 : f32 to vector<8x128xf32>
      %43 = arith.select %39, %6, %42 : vector<8x128xi1>, vector<8x128xf32>
      %cst_14 = arith.constant 0.000000e+00 : f32
      %44 = vector.broadcast %cst_14 : f32 to vector<8x128xf32>
      %45 = arith.select %39, %7, %44 : vector<8x128xi1>, vector<8x128xf32>
      %cst_15 = arith.constant 0.000000e+00 : f32
      %46 = vector.broadcast %cst_15 : f32 to vector<8x128xf32>
      %47 = arith.select %39, %29, %46 : vector<8x128xi1>, vector<8x128xf32>
      %c0_16 = arith.constant 0 : index
      %c0_17 = arith.constant 0 : index
      %c0_18 = arith.constant 0 : index
      %c0_19 = arith.constant 0 : index
      %48 = vector.load %arg4[%c0_16, %c0_17, %c0_18, %c0_19] : memref<1x4x8x128xf32, #tpu.memory_space<vmem>>, vector<1x1x8x128xf32>
      %49 = vector.shape_cast %48 : vector<1x1x8x128xf32> to vector<8x128xf32>
      %50 = vector.shape_cast %41 : vector<8x128xf32> to vector<1x8x128xf32>
      %cst_20 = arith.constant dense<0.000000e+00> : vector<8x128xf32>
      %51 = vector.multi_reduction <add>, %50, %cst_20 [0] : vector<1x8x128xf32> to vector<8x128xf32>
      %52 = arith.addf %49, %51 : vector<8x128xf32>
      %c0_21 = arith.constant 0 : index
      %c0_22 = arith.constant 0 : index
      %c0_23 = arith.constant 0 : index
      %c0_24 = arith.constant 0 : index
      %53 = vector.load %arg4[%c0_21, %c0_22, %c0_23, %c0_24] : memref<1x4x8x128xf32, #tpu.memory_space<vmem>>, vector<1x1x8x128xf32>
      %54 = vector.shape_cast %53 : vector<1x1x8x128xf32> to vector<8x128xf32>
      %55 = vector.shape_cast %52 : vector<8x128xf32> to vector<1x1x8x128xf32>
      tpu.vector_store %arg4[%c0_21, %c0_22, %c0_23, %c0_24], %55 {strides = array<i32>} : memref<1x4x8x128xf32, #tpu.memory_space<vmem>>, vector<1x1x8x128xf32>,
      %c0_25 = arith.constant 0 : index
      %c1 = arith.constant 1 : index
      %c0_26 = arith.constant 0 : index
      %c0_27 = arith.constant 0 : index
      %56 = vector.load %arg4[%c0_25, %c1, %c0_26, %c0_27] : memref<1x4x8x128xf32, #tpu.memory_space<vmem>>, vector<1x1x8x128xf32>
      %57 = vector.shape_cast %56 : vector<1x1x8x128xf32> to vector<8x128xf32>
      %58 = vector.shape_cast %43 : vector<8x128xf32> to vector<1x8x128xf32>
      %cst_28 = arith.constant dense<0.000000e+00> : vector<8x128xf32>
      %59 = vector.multi_reduction <add>, %58, %cst_28 [0] : vector<1x8x128xf32> to vector<8x128xf32>
      %60 = arith.addf %57, %59 : vector<8x128xf32>
      %c0_29 = arith.constant 0 : index
      %c1_30 = arith.constant 1 : index
      %c0_31 = arith.constant 0 : index
      %c0_32 = arith.constant 0 : index
      %61 = vector.load %arg4[%c0_29, %c1_30, %c0_31, %c0_32] : memref<1x4x8x128xf32, #tpu.memory_space<vmem>>, vector<1x1x8x128xf32>
      %62 = vector.shape_cast %61 : vector<1x1x8x128xf32> to vector<8x128xf32>
      %63 = vector.shape_cast %60 : vector<8x128xf32> to vector<1x1x8x128xf32>
      tpu.vector_store %arg4[%c0_29, %c1_30, %c0_31, %c0_32], %63 {strides = array<i32>} : memref<1x4x8x128xf32, #tpu.memory_space<vmem>>, vector<1x1x8x128xf32>,
      %c0_33 = arith.constant 0 : index
      %c2 = arith.constant 2 : index
      %c0_34 = arith.constant 0 : index
      %c0_35 = arith.constant 0 : index
      %64 = vector.load %arg4[%c0_33, %c2, %c0_34, %c0_35] : memref<1x4x8x128xf32, #tpu.memory_space<vmem>>, vector<1x1x8x128xf32>
      %65 = vector.shape_cast %64 : vector<1x1x8x128xf32> to vector<8x128xf32>
      %66 = vector.shape_cast %45 : vector<8x128xf32> to vector<1x8x128xf32>
      %cst_36 = arith.constant dense<0.000000e+00> : vector<8x128xf32>
      %67 = vector.multi_reduction <add>, %66, %cst_36 [0] : vector<1x8x128xf32> to vector<8x128xf32>
      %68 = arith.addf %65, %67 : vector<8x128xf32>
      %c0_37 = arith.constant 0 : index
      %c2_38 = arith.constant 2 : index
      %c0_39 = arith.constant 0 : index
      %c0_40 = arith.constant 0 : index
      %69 = vector.load %arg4[%c0_37, %c2_38, %c0_39, %c0_40] : memref<1x4x8x128xf32, #tpu.memory_space<vmem>>, vector<1x1x8x128xf32>
      %70 = vector.shape_cast %69 : vector<1x1x8x128xf32> to vector<8x128xf32>
      %71 = vector.shape_cast %68 : vector<8x128xf32> to vector<1x1x8x128xf32>
      tpu.vector_store %arg4[%c0_37, %c2_38, %c0_39, %c0_40], %71 {strides = array<i32>} : memref<1x4x8x128xf32, #tpu.memory_space<vmem>>, vector<1x1x8x128xf32>,
      %c0_41 = arith.constant 0 : index
      %c3 = arith.constant 3 : index
      %c0_42 = arith.constant 0 : index
      %c0_43 = arith.constant 0 : index
      %72 = vector.load %arg4[%c0_41, %c3, %c0_42, %c0_43] : memref<1x4x8x128xf32, #tpu.memory_space<vmem>>, vector<1x1x8x128xf32>
      %73 = vector.shape_cast %72 : vector<1x1x8x128xf32> to vector<8x128xf32>
      %74 = vector.shape_cast %47 : vector<8x128xf32> to vector<1x8x128xf32>
      %cst_44 = arith.constant dense<0.000000e+00> : vector<8x128xf32>
      %75 = vector.multi_reduction <add>, %74, %cst_44 [0] : vector<1x8x128xf32> to vector<8x128xf32>
      %76 = arith.addf %73, %75 : vector<8x128xf32>
      %c0_45 = arith.constant 0 : index
      %c3_46 = arith.constant 3 : index
      %c0_47 = arith.constant 0 : index
      %c0_48 = arith.constant 0 : index
      %77 = vector.load %arg4[%c0_45, %c3_46, %c0_47, %c0_48] : memref<1x4x8x128xf32, #tpu.memory_space<vmem>>, vector<1x1x8x128xf32>
      %78 = vector.shape_cast %77 : vector<1x1x8x128xf32> to vector<8x128xf32>
      %79 = vector.shape_cast %76 : vector<8x128xf32> to vector<1x1x8x128xf32>
      tpu.vector_store %arg4[%c0_45, %c3_46, %c0_47, %c0_48], %79 {strides = array<i32>} : memref<1x4x8x128xf32, #tpu.memory_space<vmem>>, vector<1x1x8x128xf32>,
    } else {
    }
    return
  }
  func.func @transform_0(%arg0: i32, %arg1: i32) -> (i32, i32) {
    %c1_i32 = arith.constant 1 : i32
    %0 = arith.muli %arg0, %c1_i32 : i32
    %1 = arith.addi %0, %arg1 : i32
    %c1_i32_0 = arith.constant 1 : i32
    %2 = arith.minsi %1, %c1_i32_0 : i32
    %c0_i32 = arith.constant 0 : i32
    %c0_i32_1 = arith.constant 0 : i32
    return %2, %c0_i32 : i32, i32
  }
  func.func @transform_1(%arg0: i32, %arg1: i32) -> (i32, i32) {
    %c1_i32 = arith.constant 1 : i32
    %0 = arith.muli %arg0, %c1_i32 : i32
    %1 = arith.addi %0, %arg1 : i32
    %c1_i32_0 = arith.constant 1 : i32
    %2 = arith.minsi %1, %c1_i32_0 : i32
    %c0_i32 = arith.constant 0 : i32
    %c0_i32_1 = arith.constant 0 : i32
    return %2, %c0_i32 : i32, i32
  }
  func.func @transform_2(%arg0: i32, %arg1: i32) -> (i32, i32, i32, i32) {
    %c0_i32 = arith.constant 0 : i32
    %c0_i32_0 = arith.constant 0 : i32
    %c0_i32_1 = arith.constant 0 : i32
    %c0_i32_2 = arith.constant 0 : i32
    return %arg0, %c0_i32, %c0_i32_0, %c0_i32_1 : i32, i32, i32, i32
  }
}

</mosaic_0001>

<bundles_post_ra>
// kernel: tpu_custom_call.1
= control target key start
LH: loop header
LB: loop body
LE: loop exit
PB: predicated region body
PF: predicated region fallthrough
CT: control target
= control target key end

     0   :  { %7 = vsyncpa [#allocation3], 0  ;;  %s1080_s0 = inlined_call_operand.hbm [shape: f32[16,128], index: 0, kind: input, shape index: {}]   ;;  %s1081_s1 = inlined_call_operand.hbm [shape: f32[16,128], index: 1, kind: input, shape index: {}]   ;;  %s1082_s2 = inlined_call_operand.hbm [shape: f32[2,4,8,128], index: 2, kind: output, shape index: {}]  }
   0x1   :  { %9 = vsyncpa [#allocation3 + $0x1], 0 }
   0x2   :  { %10 = vsyncpa [#allocation6], 0 }
   0x3   :  { %12 = vsyncpa [#allocation6 + $0x1], 0 }
   0x4   :  { %13 = vsyncpa [#allocation4], 0 }
   0x5   :  { %15 = vsyncpa [#allocation4 + $0x1], 0  ;;  %s776_s9 = smov 0   ;;  %s778_s10 = smov 0  }
   0x6   :  { %s780_s11 = smov 0   ;;  %s782_s12 = smov 0  }
   0x7   :  { %s784_s13 = smov 0   ;;  %s786_s14 = smov 0  }
   0x8   :  { %s788_s15 = smov 0   ;;  %s790_s16 = smov 0  }
   0x9   :  { %s792_s17 = smov 0  }
   0xa LB: > { %s448_s18 = sadd.s32 4294967295, %s753_s17   ;;  %s449_s19 = sadd.s32 4294967294, %s753_s17   ;;  %s753_s17 = sphi %s792_s17, %s21_s17   ;;  %s749_s16 = sphi %s790_s16, %s1107_s16   ;;  %s745_s15 = sphi %s788_s15, %s1106_s15   ;;  %s741_s14 = sphi %s786_s14, %s1105_s14   ;;  %s737_s13 = sphi %s784_s13, %s1104_s13   ;;  %s733_s12 = sphi %s782_s12, %s1103_s12   ;;  %s729_s11 = sphi %s780_s11, %s1102_s11   ;;  %s725_s10 = sphi %s778_s10, %s1101_s10   ;;  %s721_s9 = sphi %s776_s9, %s1100_s9  }
   0xb   : > { %s33_s20 = sadd.s32 1, %s749_s16  ;;  %p38_p0 = scmp.lt.s32.totalorder %s749_s16, 1 }
   0xc   : > { %p35_p1 = scmp.ge.s32.totalorder %s33_s20, 2  ;;  %s46_s21 = sadd.s32 1, %s741_s14 }
   0xd   : > { %s825_s22 = scalar_select %p38_p0, %s749_s16, 1 }
   0xe   : > { %s1109_s20 = smov (%p35_p1, %s33_s20), 0  ;;  %p53_p2 = scmp.ne.s32.totalorder %s741_s14, %s737_s13 }
   0xf   : > { %p54_p3 = scmp.eq.s32.totalorder %s753_s17, 0  ;;  %p41_p4 = scmp.lt.s32.totalorder %s1109_s20, 1 }
  0x10   : > { %p59_p5 = scmp.ne.s32.totalorder %s737_s13, %s733_s12  ;;  %p60_p7 = scmp.eq.s32.totalorder %s448_s18, 0 }
  0x11   : > { %p834_p6 = por %p54_p3, %p53_p2  ;;  %s101_s26 = ssub.s32 %s749_s16, %s1109_s20 }
  0x12   : > { %s42_s24 = scalar_select %p41_p4, %s1109_s20, 1 }
  0x13   : > { %p839_p8 = por %p60_p7, %p59_p5  ;;  %p102_p9 = scmp.eq.s32.totalorder %s101_s26, 0 }
  0x14   : > { %s43_s27 = ssub.s32 %s825_s22, %s42_s24  ;;  %s104_s28 = sadd.s32 1, %s729_s11 }
  0x15   : > { %s1087_s25 = scalar_select %p839_p8, 1, 0 }
  0x16   : > { %p44_p10 = scmp.eq.s32.totalorder %s43_s27, 0  ;;  %p114_p11 = scmp.ne.s32.totalorder %s729_s11, %s725_s10 }
  0x17   : > { %s848_s29 = scalar_select %p102_p9, %s729_s11, %s104_s28  }
  0x18   : > { %s851_s30 = scalar_select %p44_p10, %s741_s14, %s46_s21  }
  0x19   : > { %p115_p12 = scmp.eq.s32.totalorder %s448_s18, 1  ;;  %p120_p13 = scmp.ne.s32.totalorder %s725_s10, %s721_s9 }
  0x1a   : > { %p121_p0 = scmp.eq.s32.totalorder %s449_s19, 1  ;;  %p498_p4 = scmp.lt.s32.totalorder %s753_s17, 2 }
  0x1b   : > { %p857_p1 = por %p115_p12, %p114_p11  ;;  %s868_s5 = sand.u32 1, %s741_s14  }
  0x1c   : > { %p862_p3 = por %p121_p0, %p120_p13  ;;  %s453_s6 = sshll.u32 %s825_s22, 7 }
  0x1d   : > { %s1088_s3 = scalar_select %p857_p1, 1, 0 }
  0x1e   : > { %s1089_s4 = scalar_select %p862_p3, 1, 0 }
  0x1f   : > { %s1083_s7 = sshll.u32 %s868_s5, 3  ;;  %s877_s18 = scalar_lea.hbm %s1080_s0, %s453_s6 }
  0x20   : > { %s145_s19 = scalar_lea.vmem [#allocation2], %s1083_s7  ;;  %p883_p5 = pnand %p498_p4, %p834_p6 }
  0x21   : > { %s155_s21 = sshll.u32 %s145_s19, 4  ;;  %s142_s26 = scalar_lea.sflag [#allocation3], %s868_s5  ;;  %s887_s21 = int_to_ptr.vmem [resolvable:$true] %s155_s21 }
  0x22   : > { %s583_s27 = scalar_lea.hbm %s877_s18, 128  ;;  %p585_p11 = pneg %p883_p5 }
  0x23   : > { %p584_p10 = scmp.ne.s32.totalorder %s877_s18, %s583_s27  ;;  %s588_s8 = scalar_lea.hbm %s1080_s0, 256 }
  0x24   : > { %p589_p6 = scmp.lt.u32.totalorder %s877_s18, %s1080_s0  ;;  %p590_p0 = scmp.lt.u32.totalorder %s588_s8, %s583_s27 }
  0x25   : > { %p586_p12 = pnand %p585_p11, %p584_p10  ;;  %p592_p2 = scmp.lt.u32.totalorder %s583_s27, %s877_s18 }
  0x26   : > { %p591_p4 = por %p590_p0, %p589_p6 }
  0x27   : > { %p587_p13 = pneg %p586_p12 }
  0x28   : > { %p593_p7 = por %p592_p2, %p591_p4 }
  0x2a   : > { %p594_p9 = pnand %p593_p7, %p587_p13 }
  0x2c   : > { %597 = shalt.err (!%p594_p9)
}
  0x2d   : > { %s598_s7 = scalar_lea.vmem %s887_s21, 128  ;;  %s755_s23 = smov [#allocation2]  }
  0x2e   : > { %p599_p10 = scmp.ne.s32.totalorder %s887_s21, %s598_s7  ;;  %s603_s28 = sshll.u32 %s755_s23, 4  ;;  %s604_s28 = int_to_ptr.vmem [resolvable:$false] %s603_s28 }
  0x2f   : > { %s605_s12 = scalar_lea.vmem %s604_s28, 256  ;;  %p606_p1 = scmp.lt.s32.totalorder %s887_s21, %s604_s28 }
  0x30   : > { %p601_p12 = pnand %p599_p10, %p585_p11  ;;  %p607_p6 = scmp.lt.s32.totalorder %s605_s12, %s598_s7 }
  0x32   : > { %p602_p3 = pneg %p601_p12  ;;  %p608_p0 = por %p607_p6, %p606_p1 }
  0x34   : > { %p609_p2 = pnand %p608_p0, %p602_p3 }
  0x36   : > { %612 = shalt.err (!%p609_p2)
}
  0x37   : > { %490 = dma.hbm_to_vmem [thread:$0]  (!%p883_p5), %s877_s18, 128, %s887_s21, %s142_s26  }
  0x38   : > { %p1091_p7 = scmp.lt.s32.totalorder %s753_s17, 3  ;;  %p1092_p9 = scmp.ge.s32.totalorder %s753_s17, 1 }
  0x39   : > { %s930_s19 = scalar_lea.hbm %s1081_s1, %s453_s6  ;;  %s1094_s23 = sshll.u32 %s868_s5, 3 }
  0x3a   : > { %p921_p13 = pnand %p1092_p9, %p1091_p7  ;;  %s166_s28 = scalar_lea.vmem [#allocation5], %s1094_s23 }
  0x3b   : > { %s176_s12 = sshll.u32 %s166_s28, 4  ;;  %s163_s18 = scalar_lea.sflag [#allocation6], %s868_s5  ;;  %s177_s12 = int_to_ptr.vmem [resolvable:$true] %s176_s12 }
  0x3c   : > { %s1093_s27 = scalar_select %p921_p13, 1, 0 }
  0x3d   : > { %s613_s21 = scalar_lea.hbm %s930_s19, 128  ;;  %s618_s6 = scalar_lea.hbm %s1081_s1, 256 }
  0x3e   : > { %p614_p1 = scmp.ne.s32.totalorder %s930_s19, %s613_s21  ;;  %p619_p10 = scmp.lt.u32.totalorder %s930_s19, %s1081_s1 }
  0x3f   : > { %p620_p12 = scmp.lt.u32.totalorder %s618_s6, %s613_s21  ;;  %p622_p0 = scmp.lt.u32.totalorder %s613_s21, %s930_s19 }
  0x40   : > { %p616_p3 = pnand %p614_p1, %p585_p11 }
  0x41   : > { %p621_p6 = por %p620_p12, %p619_p10 }
  0x42   : > { %p617_p4 = pneg %p616_p3 }
  0x43   : > { %p623_p2 = por %p622_p0, %p621_p6 }
  0x45   : > { %p624_p7 = pnand %p623_p2, %p617_p4 }
  0x47   : > { %627 = shalt.err (!%p624_p7)
}
  0x48   : > { %s628_s5 = scalar_lea.vmem %s177_s12, 128  ;;  %s756_s23 = smov [#allocation5]  }
  0x49   : > { %p629_p9 = scmp.ne.s32.totalorder %s177_s12, %s628_s5  ;;  %s633_s28 = sshll.u32 %s756_s23, 4  ;;  %s634_s28 = int_to_ptr.vmem [resolvable:$false] %s633_s28 }
  0x4a   : > { %s635_s22 = scalar_lea.vmem %s634_s28, 256  ;;  %p636_p8 = scmp.lt.s32.totalorder %s177_s12, %s634_s28 }
  0x4b   : > { %p631_p1 = pnand %p629_p9, %p585_p11  ;;  %p637_p13 = scmp.lt.s32.totalorder %s635_s22, %s628_s5 }
  0x4d   : > { %p632_p3 = pneg %p631_p1  ;;  %p638_p10 = por %p637_p13, %p636_p8 }
  0x4f   : > { %p639_p12 = pnand %p638_p10, %p632_p3 }
  0x51   : > { %642 = shalt.err (!%p639_p12)
}
  0x52   : > { %493 = dma.hbm_to_vmem [thread:$0]  (!%p883_p5), %s930_s19, 128, %s177_s12, %s163_s18  }
  0x53   : > { %p1095_p4 = scmp.ne.s32.totalorder %s1093_s27, 0 }
  0x54   : > { %s187_s21 = sand.u32 (!%p1095_p4), 1, %s737_s13   ;;  %p1096_p11 = scmp.ne.s32.totalorder (!%p1095_p4), %s1087_s25, 0 }
  0x55   : > { %185 = sbr.rel (%p1095_p4) target bundleno = 178 (0xb2), region = 28  ;;  %s457_s26 = sshll.u32 (!%p1095_p4), %s187_s21, 3 }
  0x56   : > { %s188_s6 = scalar_lea.sflag (!%p1095_p4), [#allocation3], %s187_s21  ;;  %s191_s7 = scalar_lea.vmem (!%p1095_p4), [#allocation2], %s457_s26 }
  0x5c   : > { %708 = dma.done.wait (%p1096_p11), %s188_s6, 128  }
  0x5d   : > { %710 = vsyncadd (%p1096_p11), %s188_s6, 4294967168  ;;  %s197_s8 = scalar_lea.sflag [#allocation6], %s187_s21  ;;  %s200_s5 = scalar_lea.vmem [#allocation5], %s457_s26 }
  0x5e   : > { %712 = dma.done.wait (%p1096_p11), %s197_s8, 128  }
  0x5f   : > { %714 = vsyncadd (%p1096_p11), %s197_s8, 4294967168  ;;  %s223_s24 = sand.u32 1, %s725_s10   ;;  %s460_s27 = sshll.u32 %s745_s15, 10  ;;  %v757_v0 = vmov 0.0   ;;  %v242_v1 = vld [vmem:[%s191_s7] sm:$0xff]  ;;  %v979_v2 = vld [vmem:[%s200_s5] sm:$0xff] }
  0x60   : > { %s459_s19 = sshll.u32 %s223_s24, 5  ;;  %s971_s12 = sadd.s32 1024, %s460_s27 }
  0x61   : > { %s973_s18 = scalar_lea.vmem [#allocation7], %s459_s19  ;;  %p461_p8 = scmp.gt.s32.totalorder %s971_s12, 2048 }
  0x62   : > { %236 = vst [vmem:[%s973_s18] sm:$0xff] %v757_v0  ;;  %237 = vst [vmem:[%s973_s18 + $0x8] sm:$0xff] %v757_v0  ;;  %v262_v3 = vmul.f32 (!%p461_p8), %v979_v2, %v242_v1  ;;  %v250_v7 = vmax.f32 (!%p461_p8), %v242_v1, 1e-09  ;;  %v255_v13 = vsub.f32 (!%p461_p8), 1.0, %v979_v2 }
  0x63   : > { %238 = vst [vmem:[%s973_s18 + $0x10] sm:$0xff] %v757_v0  ;;  %239 = vst [vmem:[%s973_s18 + $0x18] sm:$0xff] %v757_v0  ;;  %249 = sbr.rel (%p461_p8) target bundleno = 124 (0x7c), region = 44 }
  0x64   : > { %v251_v11 = vmin.f32 (!%p461_p8), %v250_v7, 0.9999999  ;;  %v256_v16 = vmul.f32 (!%p461_p8), 0.7, %v255_v13 }
  0x66   : > { %575 = vlog2.f32 (!%p461_p8), %v251_v11  ;;  %v257_v12 = vsub.f32 (!%p461_p8), 1.0, %v251_v11 }
  0x68   : > { %577 = vlog2.f32 (!%p461_p8), %v257_v12 }
  0x69   : > { %v263_v4 = vld [vmem:[%s973_s18] sm:$0xff] (!%p461_p8)  ;;  %v462_v5 = vld [vmem:[%s973_s18 + $0x8] sm:$0xff] (!%p461_p8) }
  0x6a   : > { %v464_v6 = vld [vmem:[%s973_s18 + $0x10] sm:$0xff]  ;;  %v270_v8 = vadd.f32 %v462_v5, %v242_v1  ;;  %v265_v10 = vadd.f32 %v263_v4, %v262_v3  ;;  %v466_v21 = vld [vmem:[%s973_s18 + $0x18] sm:$0xff] }
  0x6b   : > { %v275_v9 = vadd.f32 %v464_v6, %v979_v2 }
  0x6c   : > { %463 = vst [vmem:[%s973_s18 + $0x8] sm:$0xff] %v270_v8  ;;  %266 = vst [vmem:[%s973_s18] sm:$0xff] %v265_v10 }
  0x6d   : > { %465 = vst [vmem:[%s973_s18 + $0x10] sm:$0xff] %v275_v9 }
  0x70   : > { %v576_v14 = vpop.eup %575 }
  0x71   : > { %v253_v15 = vmul.f32 0.6931472, %v576_v14 }
  0x72   : > { %v578_v17 = vpop.eup %577 }
  0x73   : > { %v254_v18 = vmul.f32 %v253_v15, %v979_v2  ;;  %v259_v19 = vmul.f32 0.6931472, %v578_v17 }
  0x75   : > { %v260_v20 = vmul.f32 %v259_v19, %v256_v16 }
  0x77   : > { %v261_v22 = vadd.f32 %v260_v20, %v254_v18 }
  0x79   : > { %v280_v23 = vadd.f32 %v466_v21, %v261_v22 }
  0x7b   : > { %467 = vst [vmem:[%s973_s18 + $0x18] sm:$0xff] %v280_v23 }
  0x7c PF: > { %p468_p5 = scmp.le.s32.totalorder %s971_s12, 2048 }
  0x7d   : > { %v298_v24 = vlaneseq (!%p468_p5)  ;;  %v285_v25 = vmax.f32 (!%p468_p5), %v242_v1, 1e-09  ;;  %v303_v28 = vstv (!%p468_p5), %s460_s27  ;;  %v297_v33 = vmul.f32 (!%p468_p5), %v979_v2, %v242_v1  ;;  %v311_v35 = vld [vmem:[%s973_s18] sm:$0xff] (!%p468_p5)  ;;  %v469_v36 = vld [vmem:[%s973_s18 + $0x8] sm:$0xff] (!%p468_p5)  ;;  %v471_v37 = vld [vmem:[%s973_s18 + $0x10] sm:$0xff] (!%p468_p5) }
  0x7e   : > { %284 = sbr.rel (%p468_p5) target bundleno = 152 (0x98), region = 48  ;;  %v290_v41 = vsub.f32 (!%p468_p5), 1.0, %v979_v2 }
  0x7f   : > { %v299_v26 = vshrl.u32 (!%p468_p5), %v298_v24, 7  ;;  %v286_v27 = vmin.f32 (!%p468_p5), %v285_v25, 0.9999999  ;;  %v301_v29 = vand.u32 (!%p468_p5), 127, %v298_v24 }
  0x80   : > { %v291_v47 = vmul.f32 (!%p468_p5), 0.7, %v290_v41 }
  0x81   : > { %v302_v30 = vmul.u32 (!%p468_p5), 128, %v299_v26  ;;  %579 = vlog2.f32 (!%p468_p5), %v286_v27  ;;  %v292_v31 = vsub.f32 (!%p468_p5), 1.0, %v286_v27 }
  0x82   : > { %v473_v53 = vld [vmem:[%s973_s18 + $0x18] sm:$0xff] (!%p468_p5) }
  0x83   : > { %v304_v32 = vadd.s32 (!%p468_p5), %v303_v28, %v302_v30  ;;  %581 = vlog2.f32 (!%p468_p5), %v292_v31 }
  0x85   : > { %v305_v34 = vadd.s32 %v304_v32, %v301_v29 }
  0x87   : > { %vm306_vm0 = vcmp.lt.s32.totalorder %v305_v34, 2048 }
  0x88   : > { %v307_v38 = vsel %vm306_vm0, %v297_v33, 0.0  ;;  %v308_v39 = vsel %vm306_vm0, %v242_v1, 0.0  ;;  %v309_v40 = vsel %vm306_vm0, %v979_v2, 0.0 }
  0x89   : > { %v313_v42 = vadd.f32 %v311_v35, %v307_v38  ;;  %v318_v43 = vadd.f32 %v469_v36, %v308_v39  ;;  %v323_v44 = vadd.f32 %v471_v37, %v309_v40 }
  0x8b   : > { %v580_v45 = vpop.eup %579  ;;  %314 = vst [vmem:[%s973_s18] sm:$0xff] %v313_v42  ;;  %470 = vst [vmem:[%s973_s18 + $0x8] sm:$0xff] %v318_v43 }
  0x8c   : > { %472 = vst [vmem:[%s973_s18 + $0x10] sm:$0xff] %v323_v44  ;;  %v288_v46 = vmul.f32 0.6931472, %v580_v45 }
  0x8d   : > { %v582_v48 = vpop.eup %581 }
  0x8e   : > { %v289_v49 = vmul.f32 %v288_v46, %v979_v2  ;;  %v294_v50 = vmul.f32 0.6931472, %v582_v48 }
  0x90   : > { %v295_v51 = vmul.f32 %v294_v50, %v291_v47 }
  0x92   : > { %v296_v52 = vadd.f32 %v295_v51, %v289_v49 }
  0x94   : > { %v310_v54 = vsel %vm306_vm0, %v296_v52, 0.0 }
  0x95   : > { %v328_v55 = vadd.f32 %v473_v53, %v310_v54 }
  0x97   : > { %474 = vst [vmem:[%s973_s18 + $0x18] sm:$0xff] %v328_v55 }
  0x98 PF: > { %s480_s25 = sshll.u32 %s745_s15, 9  ;;  %s344_s21 = sshll.u32 %s973_s18, 4  ;;  %s1020_s21 = int_to_ptr.vmem [resolvable:$true] %s344_s21 }
  0x99   : > { %s1017_s22 = scalar_lea.hbm %s1082_s2, %s480_s25  ;;  %s1024_s26 = scalar_lea.sflag [#allocation4], %s223_s24 }
  0x9a   : > { %s643_s6 = scalar_lea.vmem %s1020_s21, 512  ;;  %p1097_p6 = scmp.ne.s32.totalorder %s1088_s3, 0 }
  0x9b   : > { %p644_p13 = scmp.ne.s32.totalorder %s1020_s21, %s643_s6  ;;  %s758_s15 = smov [#allocation7]  }
  0x9c   : > { %s647_s7 = sshll.u32 %s758_s15, 4  ;;  %s648_s7 = int_to_ptr.vmem [resolvable:$false] %s647_s7 }
  0x9d   : > { %p645_p0 = pnand %p644_p13, %p1097_p6  ;;  %s649_s8 = scalar_lea.vmem %s648_s7, 1024 }
  0x9e   : > { %p650_p7 = scmp.lt.s32.totalorder %s1020_s21, %s648_s7  ;;  %p651_p9 = scmp.lt.s32.totalorder %s649_s8, %s643_s6 }
  0x9f   : > { %p646_p2 = pneg %p645_p0 }
  0xa0   : > { %p652_p1 = por %p651_p9, %p650_p7 }
  0xa2   : > { %p653_p3 = pnand %p652_p1, %p646_p2 }
  0xa4   : > { %656 = shalt.err (!%p653_p3)
}
  0xa5   : > { %s657_s5 = scalar_lea.hbm %s1017_s22, 512  ;;  %s661_s19 = scalar_lea.hbm %s1082_s2, 1024 }
  0xa6   : > { %p658_p10 = scmp.ne.s32.totalorder %s1017_s22, %s657_s5  ;;  %p662_p11 = scmp.lt.u32.totalorder %s1017_s22, %s1082_s2 }
  0xa7   : > { %p663_p8 = scmp.lt.u32.totalorder %s661_s19, %s657_s5  ;;  %p665_p13 = scmp.lt.u32.totalorder %s657_s5, %s1017_s22 }
  0xa8   : > { %p659_p12 = pnand %p658_p10, %p1097_p6 }
  0xa9   : > { %p664_p5 = por %p663_p8, %p662_p11 }
  0xaa   : > { %p660_p4 = pneg %p659_p12 }
  0xab   : > { %p666_p0 = por %p665_p13, %p664_p5 }
  0xad   : > { %p667_p2 = pnand %p666_p0, %p660_p4 }
  0xaf   : > { %670 = shalt.err (!%p667_p2)
}
  0xb0   : > { %s759_s25 = smov 128   ;;  %s760_s23 = smov 8  }
  0xb1   : > { %485 = dma.vmem_to_hbm [thread:$0]  (%p1097_p6), %s1020_s21, 512, %s1017_s22, %s1024_s26, %s759_s25, %s759_s25, %s760_s23  }
  0xb2 PF: > { %s359_s28 = sand.u32 1, %s721_s9   ;;  %p1098_p7 = scmp.ne.s32.totalorder %s1089_s4, 0 }
  0xb3   : > { %p1099_p9 = scmp.ge.s32.totalorder %s753_s17, 2  ;;  %s360_s6 = scalar_lea.sflag [#allocation4], %s359_s28 }
  0xb5   : > { %p495_p1 = pnand %p1099_p9, %p1098_p7 }
  0xb7   : > { %716 = dma.done.wait (!%p495_p1), %s360_s6, 512  }
  0xb8   : > { %718 = vsyncadd (!%p495_p1), %s360_s6, 4294966784  ;;  %s21_s17 = sadd.s32 1, %s753_s17   ;;  %s1100_s9 = smov %s725_s10 }
  0xb9   : > { %p18_p3 = scmp.ge.s32.totalorder %s21_s17, 4   ;;  %s1101_s10 = smov %s729_s11 }
  0xba   : > { %s1102_s11 = smov %s848_s29  ;;  %s1103_s12 = smov %s737_s13 }
  0xbb   : > { %s1104_s13 = smov %s741_s14  ;;  %s1105_s14 = smov %s851_s30 }
  0xbc   : > { %s1106_s15 = smov %s749_s16  ;;  %s1107_s16 = smov %s1109_s20 }
  0xbd   :  { %20 = sbr.rel (!%p18_p3) target bundleno = 10 (0xa), region = 104 }
  0xc4   :  { %365 = vsyncpa [#allocation3], 1 }
  0xc5   :  { %367 = vsyncpa [#allocation3 + $0x1], 1 }
  0xc6   :  { %368 = vsyncpa [#allocation6], 1 }
  0xc7   :  { %370 = vsyncpa [#allocation6 + $0x1], 1 }
  0xc8   :  { %371 = vsyncpa [#allocation4], 1 }
  0xc9   :  { %373 = vsyncpa [#allocation4 + $0x1], 1 }

</bundles_post_ra>
